<compile_context>
chip_gen: v7x
topology: tpu7x:2x2x1
jax: 0.10.0
libtpu: 0.0.40
codegen_flags: <defaults>
</compile_context>

<pallas_src>
import math

import jax
import jax.numpy as jnp
from jax.experimental import pallas as pl
from jax.experimental.pallas import tpu as pltpu


def _patch_proj_kernel(x_ref, w_ref, b_ref, o_ref):
    # x_ref: (K, TN) patch columns, w_ref: (E, K), b_ref: (E, 1), o_ref: (E, TN)
    acc = jnp.dot(w_ref[...], x_ref[...], preferred_element_type=jnp.float32)
    o_ref[...] = (acc + b_ref[...].astype(jnp.float32)).astype(o_ref.dtype)


def _pick_spatial_tile(n, batch, cap=4096):
    """Lane tile over the per-batch spatial axis.

    Largest multiple of 128 <= min(n, cap): big tiles amortize the ~0.35 us
    per-grid-step overhead, multiples of 128 keep stores unmasked, and at the
    cap the double-buffered VMEM footprint is only ~5 MiB (f32), well under
    the 32 MiB default scoped limit on every generation including v7x.
    """
    if n < 128:
        return max(n, 1)                      # tiny input: one full-extent block
    tn = min(cap, (n // 128) * 128)
    # v7x megacore: prefer >= 2 total grid steps (only an issue when batch==1
    # and a single tile would cover all of n).
    if batch * (-(-n // tn)) < 2 and n >= 256:
        tn = ((-(-n // 2) + 127) // 128) * 128
    return tn


def patch_embed_3d(x, weight, bias, patch_size=(1, 4, 4)):
    """PatchEmbed3D forward (norm_layer=None path).

    x:      (B, C_in, D, H, W)      -- feed bf16 for the HBM/MXU fast path
    weight: (embed_dim, C_in, pd, ph, pw)   -- torch Conv3d weight layout
    bias:   (embed_dim,)            -- kept/added in f32 inside the kernel
    returns (B, embed_dim, D', H', W') in x.dtype
    """
    pd, ph, pw = patch_size
    B, C, D, H, W = x.shape
    E = weight.shape[0]

    # ---- F.pad-equivalent trailing zero padding so each dim divides patch.
    pad_d, pad_h, pad_w = (-D) % pd, (-H) % ph, (-W) % pw
    if pad_d or pad_h or pad_w:
        x = jnp.pad(x, ((0, 0), (0, 0), (0, pad_d), (0, pad_h), (0, pad_w)))
    Dn, Hn, Wn = (D + pad_d) // pd, (H + pad_h) // ph, (W + pad_w) // pw

    K = C * pd * ph * pw
    N = Dn * Hn * Wn

    # ---- im2col in (B, K, N) layout: K = (C,pd,ph,pw) patch elements on
    # sublanes, N = (Dn,Hn,Wn) patch positions on lanes (lane-dense output).
    # TODO(synk): fold this relayout into the kernel (memory_space=pl.ANY +
    # in-VMEM einshape per tile) to drop this one remaining HBM pass over the
    # input slab.
    x_kn = x.reshape(B, C, Dn, pd, Hn, ph, Wn, pw)
    x_kn = x_kn.transpose(0, 1, 3, 5, 7, 2, 4, 6).reshape(B, K, N)

    # Conv3d weight (E, C, pd, ph, pw) -> (E, K); same (C,pd,ph,pw) flattening.
    w2d = weight.reshape(E, K)
    b2d = bias.reshape(E, 1).astype(jnp.float32)

    TN = _pick_spatial_tile(N, B)
    grid = (B, -(-N // TN))           # ragged last tile handled by Pallas masking
    out_dtype = x.dtype

    flops = 2 * B * N * K * E
    bytes_accessed = (x_kn.size * x_kn.dtype.itemsize
                      + w2d.size * w2d.dtype.itemsize
                      + b2d.size * b2d.dtype.itemsize
                      + B * E * N * jnp.dtype(out_dtype).itemsize)

    out = pl.pallas_call(
        _patch_proj_kernel,
        out_shape=jax.ShapeDtypeStruct((B, E, N), out_dtype),
        grid_spec=pltpu.PrefetchScalarGridSpec(
            num_scalar_prefetch=0,
            grid=grid,
            in_specs=[
                pl.BlockSpec((None, K, TN), lambda b, j: (b, 0, j)),  # patches
                pl.BlockSpec((E, K), lambda b, j: (0, 0)),            # weight (resident)
                pl.BlockSpec((E, 1), lambda b, j: (0, 0)),            # bias (resident)
            ],
            out_specs=pl.BlockSpec((None, E, TN), lambda b, j: (b, 0, j)),
        ),
        compiler_params=pltpu.CompilerParams(
            dimension_semantics=("parallel", "parallel")),
        cost_estimate=pl.CostEstimate(
            flops=flops, transcendentals=0, bytes_accessed=bytes_accessed),
    )(x_kn, w2d, b2d)

    # Zero post-kernel passes: reshape to NCDHW is a pure metadata change.
    # TODO(synk): module default is norm_layer=None; a non-None norm_layer
    # would add a fused LayerNorm over E inside the same kernel.
    return out.reshape(B, E, Dn, Hn, Wn)


def _reference(x, weight, bias, patch_size):
    # Pure-JAX reference mirroring the PyTorch forward (pad + Conv3d, no norm).
    pd, ph, pw = patch_size
    B, C, D, H, W = x.shape
    x = jnp.pad(x, ((0, 0), (0, 0),
                    (0, (-D) % pd), (0, (-H) % ph), (0, (-W) % pw)))
    out = jax.lax.conv_general_dilated(
        x, weight, window_strides=patch_size, padding='VALID',
        dimension_numbers=('NCDHW', 'OIDHW', 'NCDHW'),
        precision=jax.lax.Precision.HIGHEST)
    return out + bias.reshape(1, -1, 1, 1, 1)


if __name__ == "__main__":
    # Module config: patch_size=(1,4,4), in_chans=3, embed_dim=96, norm=None.
    patch_size = (1, 4, 4)
    in_chans, embed_dim = 3, 96

    key = jax.random.PRNGKey(0)
    kx, kw, kb, kx2 = jax.random.split(key, 4)
    fan_in = in_chans * patch_size[0] * patch_size[1] * patch_size[2]
    w = jax.random.normal(kw, (embed_dim, in_chans) + patch_size,
                          dtype=jnp.float32) / math.sqrt(fan_in)
    b = jax.random.normal(kb, (embed_dim,), dtype=jnp.float32) * 0.02

    # ---- Case 1: f32, small shapes; exercises the trailing-pad path and the
    # full-extent (N < 128) spatial block.
    B, D, H, W = 2, 3, 18, 18
    x = jax.random.normal(kx, (B, in_chans, D, H, W), dtype=jnp.float32)
    out = jax.block_until_ready(patch_embed_3d(x, w, b, patch_size))
    ref = _reference(x, w, b, patch_size)
    assert out.shape == ref.shape, (out.shape, ref.shape)
    err = float(jnp.max(jnp.abs(out - ref)))
    assert jnp.allclose(out, ref, atol=1e-3, rtol=1e-3), f"f32 mismatch, max err {err}"

    # ---- Case 2: bf16 fast path (f32 accumulation in-kernel), larger spatial
    # extent so the 256-lane tile + ragged (masked) last block path runs.
    B2, D2, H2, W2 = 2, 3, 36, 38
    x2 = jax.random.normal(kx2, (B2, in_chans, D2, H2, W2), dtype=jnp.float32)
    x2_bf, w_bf = x2.astype(jnp.bfloat16), w.astype(jnp.bfloat16)
    out2 = jax.block_until_ready(patch_embed_3d(x2_bf, w_bf, b, patch_size))
    ref2 = _reference(x2_bf.astype(jnp.float32), w_bf.astype(jnp.float32), b,
                      patch_size)
    assert out2.shape == ref2.shape, (out2.shape, ref2.shape)
    err2 = float(jnp.max(jnp.abs(out2.astype(jnp.float32) - ref2)))
    assert jnp.allclose(out2.astype(jnp.float32), ref2, atol=2e-2, rtol=2e-2), \
        f"bf16 mismatch, max err {err2}"

    print("KERNEL_OK")
</pallas_src>

<mosaic_0001>
module attributes {stable_mosaic.version = 11 : i64} {
  func.func @_patch_proj_kernel(%arg0: i32, %arg1: i32, %arg2: memref<1x48x75xf32, #tpu.memory_space<vmem>>, %arg3: memref<96x48xf32, #tpu.memory_space<vmem>>, %arg4: memref<96x1xf32, #tpu.memory_space<vmem>>, %arg5: memref<1x96x75xf32, #tpu.memory_space<vmem>>) attributes {dimension_semantics = [#tpu.dimension_semantics<parallel>, #tpu.dimension_semantics<parallel>], iteration_bounds = array<i64: 2, 1>, scalar_prefetch = 0 : i64, scratch_operands = 0 : i64, tpu.core_type = #tpu.core_type<tc>, window_params = [{transform_indices = @transform_0, window_bounds = array<i64: 1, 48, 75>}, {pipeline_mode = #tpu.pipeline_mode<synchronous>, transform_indices = @transform_1, window_bounds = array<i64: 96, 48>}, {pipeline_mode = #tpu.pipeline_mode<synchronous>, transform_indices = @transform_2, window_bounds = array<i64: 96, 1>}, {transform_indices = @transform_3, window_bounds = array<i64: 1, 96, 75>}]} {
    %c0 = arith.constant 0 : index
    %c0_0 = arith.constant 0 : index
    %0 = vector.load %arg3[%c0, %c0_0] : memref<96x48xf32, #tpu.memory_space<vmem>>, vector<96x48xf32>
    %c0_1 = arith.constant 0 : index
    %c0_2 = arith.constant 0 : index
    %c0_3 = arith.constant 0 : index
    %1 = vector.load %arg2[%c0_1, %c0_2, %c0_3] : memref<1x48x75xf32, #tpu.memory_space<vmem>>, vector<1x48x75xf32>
    %2 = vector.shape_cast %1 : vector<1x48x75xf32> to vector<48x75xf32>
    %cst = arith.constant dense<0.000000e+00> : vector<96x75xf32>
    %3 = tpu.matmul %0, %2, %cst {dimension_numbers = #tpu.dot_dimension_numbers<[1], [0], [0], [1], [0, 0, 1, 1], [], []>} : vector<96x48xf32>, vector<48x75xf32>, vector<96x75xf32> -> vector<96x75xf32>
    %c0_4 = arith.constant 0 : index
    %c0_5 = arith.constant 0 : index
    %4 = vector.load %arg4[%c0_4, %c0_5] : memref<96x1xf32, #tpu.memory_space<vmem>>, vector<96x1xf32>
    %5 = vector.broadcast %4 : vector<96x1xf32> to vector<96x75xf32>
    %6 = arith.addf %3, %5 : vector<96x75xf32>
    %c0_6 = arith.constant 0 : index
    %c0_7 = arith.constant 0 : index
    %c0_8 = arith.constant 0 : index
    %7 = vector.load %arg5[%c0_6, %c0_7, %c0_8] : memref<1x96x75xf32, #tpu.memory_space<vmem>>, vector<1x96x75xf32>
    %8 = vector.shape_cast %7 : vector<1x96x75xf32> to vector<96x75xf32>
    %9 = vector.shape_cast %6 : vector<96x75xf32> to vector<1x96x75xf32>
    tpu.vector_store %arg5[%c0_6, %c0_7, %c0_8], %9 {strides = array<i32>} : memref<1x96x75xf32, #tpu.memory_space<vmem>>, vector<1x96x75xf32>,
    return
  }
  func.func @transform_0(%arg0: i32, %arg1: i32) -> (i32, i32, i32) {
    %c0_i32 = arith.constant 0 : i32
    %c0_i32_0 = arith.constant 0 : i32
    return %arg0, %c0_i32, %arg1 : i32, i32, i32
  }
  func.func @transform_1(%arg0: i32, %arg1: i32) -> (i32, i32) {
    %c0_i32 = arith.constant 0 : i32
    %c0_i32_0 = arith.constant 0 : i32
    %c0_i32_1 = arith.constant 0 : i32
    return %c0_i32, %c0_i32_0 : i32, i32
  }
  func.func @transform_2(%arg0: i32, %arg1: i32) -> (i32, i32) {
    %c0_i32 = arith.constant 0 : i32
    %c0_i32_0 = arith.constant 0 : i32
    %c0_i32_1 = arith.constant 0 : i32
    return %c0_i32, %c0_i32_0 : i32, i32
  }
  func.func @transform_3(%arg0: i32, %arg1: i32) -> (i32, i32, i32) {
    %c0_i32 = arith.constant 0 : i32
    %c0_i32_0 = arith.constant 0 : i32
    return %arg0, %c0_i32, %arg1 : i32, i32, i32
  }
}

</mosaic_0001>

<bundles_post_ra>
// kernel: tpu_custom_call.1
= control target key start
LH: loop header
LB: loop body
LE: loop exit
PB: predicated region body
PF: predicated region fallthrough
CT: control target
= control target key end

     0   :  { %s711_s12 = smov 0   ;;  %s713_s13 = smov 0   ;;  %s858_s0 = inlined_call_operand.vmem [shape: f32[2,48,75], index: 0, kind: input, shape index: {}]   ;;  %s859_s1 = inlined_call_operand.vmem [shape: f32[96,48], index: 1, kind: input, shape index: {}]   ;;  %s860_s2 = inlined_call_operand.vmem [shape: f32[96,1], index: 2, kind: input, shape index: {}]   ;;  %s861_s3 = inlined_call_operand.vmem [shape: f32[2,96,75], index: 3, kind: output, shape index: {}]  }
   0x1   :  { %s715_s14 = smov 0  }
   0x2 LB: > { %s25_s15 = sadd.s32 1, %s684_s13  ;;  %p554_p0 = scmp.ge.s32.totalorder %s688_s14, 1  ;;  %s688_s14 = sphi %s715_s14, %s13_s14   ;;  %s684_s13 = sphi %s713_s13, %s863_s13   ;;  %s680_s12 = sphi %s711_s12, %s862_s12  }
   0x3   : > { %p27_p1 = scmp.ge.s32.totalorder %s25_s15, 2  ;;  %p156_p2 = scmp.lt.s32.totalorder %s688_s14, 3 }
   0x5   : > { %s865_s15 = smov (%p27_p1, %s25_s15), 0  ;;  %p157_p3 = pnand %p554_p0, %p156_p2 }
   0x6   : > { %p186_p4 = scmp.lt.s32.totalorder (!%p157_p3), %s680_s12, 1  ;;  %v202_v0 = vld [vmem:[%s859_s1] sm:$0xff] (!%p157_p3)  ;;  %vm292_vm0 = vcmask (!%p157_p3), 392192   ;;  %v208_v1 = vld [vmem:[%s859_s1 + $0x30] sm:$0xff] (!%p157_p3)  ;;  %v690_v2 = vmov (!%p157_p3), 0   ;;  %v223_v5 = vld [vmem:[%s860_s2 + $0x18] sm:$0xff] (!%p157_p3) }
   0x7   : > { %160 = sbr.rel (%p157_p3) target bundleno = 257 (0x101), region = 32  ;;  %601 = vmatprep.mubr.msk.f32.mxu0 (!%p157_p3), %vm292_vm0, %v202_v0  ;;  %610 = vmatprep.mubr.msk.f32.mxu1 (!%p157_p3), %vm292_vm0, %v208_v1  ;;  %v222_v3 = vld [vmem:[%s860_s2 + $0x10] sm:$0xff] (!%p157_p3)  ;;  %v220_v4 = vld [vmem:[%s860_s2] sm:$0xff] (!%p157_p3)  ;;  %v221_v6 = vld [vmem:[%s860_s2 + $0x8] sm:$0xff] (!%p157_p3)  ;;  %vm454_vm1 = vcmask (!%p157_p3), 613376  }
   0x8   : > { %665 = vset.pattern.permute.xlu1 (!%p157_p3), %v690_v2  ;;  %664 = vset.pattern.permute.xlu0 (!%p157_p3), %v690_v2  ;;  %v225_v15 = vld [vmem:[%s860_s2 + $0x28] sm:$0xff] (!%p157_p3)  ;;  %v224_v16 = vld [vmem:[%s860_s2 + $0x20] sm:$0xff] (!%p157_p3)  ;;  %v227_v18 = vld [vmem:[%s860_s2 + $0x38] sm:$0xff] (!%p157_p3) }
   0x9   : > { %244 = vperm.xlu1 (!%p157_p3), %665, %v222_v3   ;;  %234 = vperm.xlu0 (!%p157_p3), %664, %v220_v4   ;;  %v226_v19 = vld [vmem:[%s860_s2 + $0x30] sm:$0xff] (!%p157_p3)  ;;  %v229_v20 = vld [vmem:[%s860_s2 + $0x48] sm:$0xff] (!%p157_p3)  ;;  %v228_v21 = vld [vmem:[%s860_s2 + $0x40] sm:$0xff] (!%p157_p3) }
   0xa   : > { %v203_v22 = vld [vmem:[%s859_s1 + $0x8] sm:$0xff] (!%p157_p3)  ;;  %v209_v23 = vld [vmem:[%s859_s1 + $0x38] sm:$0xff] (!%p157_p3)  ;;  %v204_v24 = vld [vmem:[%s859_s1 + $0x10] sm:$0xff] (!%p157_p3) }
   0xb   : > { %v210_v25 = vld [vmem:[%s859_s1 + $0x40] sm:$0xff] (!%p157_p3)  ;;  %v231_v26 = vld [vmem:[%s860_s2 + $0x58] sm:$0xff] (!%p157_p3)  ;;  %v230_v27 = vld [vmem:[%s860_s2 + $0x50] sm:$0xff] (!%p157_p3) }
   0xc   : > { %v205_v28 = vld [vmem:[%s859_s1 + $0x18] sm:$0xff] (!%p157_p3)  ;;  %v211_v29 = vld [vmem:[%s859_s1 + $0x48] sm:$0xff] (!%p157_p3)  ;;  %v206_v30 = vld [vmem:[%s859_s1 + $0x20] sm:$0xff] (!%p157_p3) }
   0xd   : > { %249 = vperm.xlu1 (!%p157_p3), %665, %v223_v5   ;;  %239 = vperm.xlu0 (!%p157_p3), %664, %v221_v6   ;;  %v212_v31 = vld [vmem:[%s859_s1 + $0x50] sm:$0xff] (!%p157_p3)  ;;  %v207_v32 = vld [vmem:[%s859_s1 + $0x28] sm:$0xff] (!%p157_p3)  ;;  %v213_v33 = vld [vmem:[%s859_s1 + $0x58] sm:$0xff] (!%p157_p3) }
   0xe   : > { %s867_s12 = smov (!%p186_p4, %s680_s12), 1 }
   0xf   : > { %s637_s20 = smul.u32 48, %s867_s12 }
  0x10   : > { %s638_s22 = smul.u32 96, %s867_s12 }
  0x11   : > { %s193_s27 = scalar_lea.vmem %s858_s0, %s637_s20  ;;  %259 = vperm.xlu1 %665, %v225_v15   ;;  %254 = vperm.xlu0 %664, %v224_v16  }
  0x12   : > { %v214_v7 = vld [vmem:[%s193_s27] sm:$0xff]  ;;  %v215_v8 = vld [vmem:[%s193_s27 + $0x8] sm:$0xff]  ;;  %v216_v9 = vld [vmem:[%s193_s27 + $0x10] sm:$0xff]  ;;  %s823_s25 = scalar_lea.vmem %s861_s3, %s638_s22 }
  0x13   : > { %v619_v10 = vpack.c.bf16 %v215_v8, %v214_v7  ;;  %v217_v11 = vld [vmem:[%s193_s27 + $0x18] sm:$0xff]  ;;  %v218_v13 = vld [vmem:[%s193_s27 + $0x20] sm:$0xff]  ;;  %v219_v14 = vld [vmem:[%s193_s27 + $0x28] sm:$0xff] }
  0x14   : > { %v623_v12 = vpack.c.bf16 %v217_v11, %v216_v9  ;;  %v627_v17 = vpack.c.bf16 %v219_v14, %v218_v13 }
  0x15   : > { %620 = vmatprep.subr.bf16.mxu0 %v619_v10  ;;  %631 = vmatprep.subr.bf16.mxu1 %v619_v10 }
  0x16   : > { %622 = vmatpush3.bf16.msra.mxu0 %v619_v10  ;;  %634 = vmatpush3.bf16.msra.mxu1 %v619_v10 }
  0x17   : > { %624 = vmatprep.subr.bf16.mxu0 %v623_v12  ;;  %632 = vmatprep.subr.bf16.mxu1 %v623_v12 }
  0x18   : > { %269 = vperm.xlu1 %665, %v227_v18   ;;  %264 = vperm.xlu0 %664, %v226_v19  }
  0x1a   : > { %626 = vmatpush3.bf16.msra.mxu0 %v623_v12  ;;  %635 = vmatpush3.bf16.msra.mxu1 %v623_v12 }
  0x1b   : > { %628 = vmatprep.subr.bf16.mxu0 %v627_v17  ;;  %633 = vmatprep.subr.bf16.mxu1 %v627_v17 }
  0x1c   : > { %279 = vperm.xlu1 %665, %v229_v20   ;;  %274 = vperm.xlu0 %664, %v228_v21  }
  0x1e   : > { %630 = vmatpush3.bf16.msra.mxu0 %v627_v17  ;;  %636 = vmatpush3.bf16.msra.mxu1 %v627_v17 }
  0x20   : > { %289 = vperm.xlu1 %665, %v231_v26   ;;  %284 = vperm.xlu0 %664, %v230_v27  }
  0x21   : > { %602 = vmatmul.mubr.msk.f32.vlgmr.msra.gmra.mrb[0].mxu0 %vm292_vm0, %v203_v22  ;;  %611 = vmatmul.mubr.msk.f32.vlgmr.msra.gmra.mrb[0].mxu1 %vm292_vm0, %v209_v23 }
  0x22   : > { %604 = vmatprep.mubr.msk.f32.mxu0 %vm292_vm0, %v204_v24  ;;  %613 = vmatprep.mubr.msk.f32.mxu1 %vm292_vm0, %v210_v25 }
  0x25   : > { %605 = vmatmul.mubr.msk.f32.gmra.mrb[2].mxu0 %vm292_vm0, %v205_v28  ;;  %614 = vmatmul.mubr.msk.f32.gmra.mrb[2].mxu1 %vm292_vm0, %v211_v29 }
  0x26   : > { %607 = vmatprep.mubr.msk.f32.mxu0 %vm292_vm0, %v206_v30  ;;  %616 = vmatprep.mubr.msk.f32.mxu1 %vm292_vm0, %v212_v31 }
  0x29   : > { %608 = vmatmul.mubr.msk.f32.gmra.mrb[4].mxu0 %vm292_vm0, %v207_v32  ;;  %617 = vmatmul.mubr.msk.f32.gmra.mrb[4].mxu1 %vm292_vm0, %v213_v33 }
  0x88   : > { %v245_v34 = vpop.permute.xlu1 %244  ;;  %v235_v35 = vpop.permute.xlu0 %234 }
  0x8c   : > { %v250_v36 = vpop.permute.xlu1 %249  ;;  %v240_v37 = vpop.permute.xlu0 %239 }
  0x90   : > { %v260_v38 = vpop.permute.xlu1 %259  ;;  %v255_v39 = vpop.permute.xlu0 %254 }
  0x97   : > { %v270_v40 = vpop.permute.xlu1 %269  ;;  %v265_v41 = vpop.permute.xlu0 %264 }
  0x9b   : > { %v280_v42 = vpop.permute.xlu1 %279  ;;  %v275_v43 = vpop.permute.xlu0 %274 }
  0x9f   : > { %v290_v60 = vpop.permute.xlu1 %289  ;;  %v285_v61 = vpop.permute.xlu0 %284 }
  0xf4   : > { %v603_v44 = vpop.f32.mrb[0].mxu0  ;;  %v612_v45 = vpop.f32.mrb[0].mxu1 }
  0xf5   : > { %v401_v46 = vadd.f32 %v603_v44, %v240_v37  ;;  %v431_v47 = vadd.f32 %v612_v45, %v270_v40  ;;  %v395_v48 = vpop.f32.mrb[1].mxu0  ;;  %v425_v49 = vpop.f32.mrb[1].mxu1 }
  0xf6   : > { %v396_v50 = vadd.f32 %v395_v48, %v235_v35  ;;  %v426_v51 = vadd.f32 %v425_v49, %v265_v41 }
  0xf7   : > { %456 = vst.msk [vmem:[%s823_s25 + $0x8] sm:$0xff] %vm454_vm1, %v401_v46  ;;  %462 = vst.msk [vmem:[%s823_s25 + $0x38] sm:$0xff] %vm454_vm1, %v431_v47 }
  0xf8   : > { %455 = vst.msk [vmem:[%s823_s25] sm:$0xff] %vm454_vm1, %v396_v50  ;;  %461 = vst.msk [vmem:[%s823_s25 + $0x30] sm:$0xff] %vm454_vm1, %v426_v51  ;;  %v606_v52 = vpop.f32.mrb[2].mxu0  ;;  %v615_v53 = vpop.f32.mrb[2].mxu1 }
  0xf9   : > { %v411_v54 = vadd.f32 %v606_v52, %v250_v36  ;;  %v441_v55 = vadd.f32 %v615_v53, %v280_v42  ;;  %v405_v56 = vpop.f32.mrb[3].mxu0  ;;  %v435_v57 = vpop.f32.mrb[3].mxu1 }
  0xfa   : > { %v406_v58 = vadd.f32 %v405_v56, %v245_v34  ;;  %v436_v59 = vadd.f32 %v435_v57, %v275_v43 }
  0xfb   : > { %458 = vst.msk [vmem:[%s823_s25 + $0x18] sm:$0xff] %vm454_vm1, %v411_v54  ;;  %464 = vst.msk [vmem:[%s823_s25 + $0x48] sm:$0xff] %vm454_vm1, %v441_v55 }
  0xfc   : > { %457 = vst.msk [vmem:[%s823_s25 + $0x10] sm:$0xff] %vm454_vm1, %v406_v58  ;;  %463 = vst.msk [vmem:[%s823_s25 + $0x40] sm:$0xff] %vm454_vm1, %v436_v59  ;;  %v609_v62 = vpop.f32.mrb[4].mxu0  ;;  %v618_v63 = vpop.f32.mrb[4].mxu1 }
  0xfd   : > { %v421_v0 = vadd.f32 %v609_v62, %v260_v38  ;;  %v451_v1 = vadd.f32 %v618_v63, %v290_v60  ;;  %v415_v2 = vpop.f32.mrb[5].mxu0  ;;  %v445_v3 = vpop.f32.mrb[5].mxu1 }
  0xfe   : > { %v416_v4 = vadd.f32 %v415_v2, %v255_v39  ;;  %v446_v5 = vadd.f32 %v445_v3, %v285_v61 }
  0xff   : > { %460 = vst.msk [vmem:[%s823_s25 + $0x28] sm:$0xff] %vm454_vm1, %v421_v0  ;;  %466 = vst.msk [vmem:[%s823_s25 + $0x58] sm:$0xff] %vm454_vm1, %v451_v1 }
 0x100   : > { %459 = vst.msk [vmem:[%s823_s25 + $0x20] sm:$0xff] %vm454_vm1, %v416_v4  ;;  %465 = vst.msk [vmem:[%s823_s25 + $0x50] sm:$0xff] %vm454_vm1, %v446_v5 }
 0x101 PF: > { %s13_s14 = sadd.s32 1, %s688_s14   ;;  %s862_s12 = smov %s684_s13 }
 0x102   : > { %p10_p5 = scmp.ge.s32.totalorder %s13_s14, 4   ;;  %s863_s13 = smov %s865_s15 }
 0x104   :  { %12 = sbr.rel (!%p10_p5) target bundleno = 2 (0x2), region = 62 }

</bundles_post_ra>
